<compile_context>
chip_gen: v7x
topology: tpu7x:2x2x1
jax: 0.10.0
libtpu: 0.0.40
codegen_flags: <defaults>
</compile_context>

<pallas_src>
import functools

import jax
import jax.numpy as jnp
from jax.experimental import pallas as pl
from jax.experimental.pallas import tpu as pltpu


_PARAM_SHAPE = (3, 3)
_PARAM_ELEMS = 9                      # param.size; layout hardcodes 3x3 params
_LANES = 128
_ROW_LEN = _PARAM_ELEMS * _LANES      # 1152 lanes: 128 whole (3,3) slabs / row
_TILE_M = 1024                        # (1024, 1152) f32 block ~= 4.5 MiB
_MIN_ELEMS_FOR_PALLAS = 16384         # below this, fused XLA multiply wins


def _round_up(v, m):
    return ((v + m - 1) // m) * m


def _mul_param_kernel(x_ref, p_ref, o_ref):
    # x_ref/o_ref: (TILE_M, 1152); p_ref: (1, 1152) resident pre-tiled param
    # (sublane broadcast only — no per-step lane broadcast work).
    o_ref[...] = x_ref[...] * p_ref[...]


def _model_param_pallas(x, param):
    """Lane-dense (M, 9*128) layout, batch-tiled along rows."""
    orig_shape = x.shape
    out_dtype = jnp.result_type(x.dtype, param.dtype)   # match torch promotion

    total = x.size
    x_flat = x.astype(out_dtype).reshape(-1)            # free flatten (bitcast)

    padded = _round_up(total, _ROW_LEN)
    if padded != total:
        # Only hit when batch % 128 != 0: one extra copy of x (bounded cost).
        x_flat = jnp.pad(x_flat, (0, padded - total))
    m = padded // _ROW_LEN
    x2 = x_flat.reshape(m, _ROW_LEN)                    # free reshape

    # Pre-tiled param: flattened x repeats the 9-element param pattern, and one
    # 1152-lane row holds exactly 128 repeats, so rows all share this pattern.
    p2 = jnp.tile(param.astype(out_dtype).reshape(-1), _LANES).reshape(1, _ROW_LEN)

    tile_m = m if m <= _TILE_M else _TILE_M             # full extent or 1024-row tiles
    grid = (pl.cdiv(m, tile_m),)                        # ragged tail handled by Pallas

    cost = pl.CostEstimate(
        flops=total,
        transcendentals=0,
        bytes_accessed=total * (x.dtype.itemsize + jnp.dtype(out_dtype).itemsize)
        + p2.size * p2.dtype.itemsize,
    )

    y2 = pl.pallas_call(
        _mul_param_kernel,
        out_shape=jax.ShapeDtypeStruct((m, _ROW_LEN), out_dtype),
        grid=grid,
        in_specs=[
            # x: tiled along rows (batch groups); lane dim is the full 1152.
            pl.BlockSpec((tile_m, _ROW_LEN), lambda i: (i, 0)),
            # param: constant index_map -> stays resident across grid steps.
            pl.BlockSpec((1, _ROW_LEN), lambda i: (0, 0)),
        ],
        out_specs=pl.BlockSpec((tile_m, _ROW_LEN), lambda i: (i, 0)),
        compiler_params=pltpu.CompilerParams(
            dimension_semantics=("parallel",),
            vmem_limit_bytes=32 * 1024 * 1024,   # 4.5 MiB blocks, 2-buffered in+out, fits v5e too
        ),
        cost_estimate=cost,
    )(x2, p2)

    y_flat = y2.reshape(-1)
    if padded != total:
        y_flat = y_flat[:total]
    return y_flat.reshape(orig_shape)


@functools.partial(jax.jit, static_argnames=("force_pallas",))
def model_param_forward(x, param, force_pallas=False):
    """Pallas equivalent of ModelParam.forward: x * param (broadcast over batch)."""
    assert x.shape[-2:] == _PARAM_SHAPE, "x trailing dims must match param (3,3)"
    if not force_pallas and x.size < _MIN_ELEMS_FOR_PALLAS:
        # Toy sizes: launch / per-step overhead dwarfs the work; let XLA fuse.
        return x * param
    return _model_param_pallas(x, param)


if __name__ == "__main__":
    key = jax.random.PRNGKey(0)
    k_param, k_x, k_mid, k_big = jax.random.split(key, 4)

    # Deterministic "parameter" init (stand-in for torch.randn((3, 3))).
    param = jax.random.normal(k_param, _PARAM_SHAPE, dtype=jnp.float32)

    # 1) Small input (batch=2, 3, 3): force the Pallas kernel so it runs.
    x = jax.random.normal(k_x, (2, 3, 3), dtype=jnp.float32)
    ref = x * param
    out = model_param_forward(x, param, force_pallas=True)
    jax.block_until_ready(out)
    assert out.shape == (2, 3, 3)
    assert jnp.allclose(out, ref, atol=1e-6, rtol=1e-6)

    # 2) Default dispatch at toy size takes the fused plain-JAX route.
    out_fused = model_param_forward(x, param)
    jax.block_until_ready(out_fused)
    assert jnp.allclose(out_fused, ref, atol=1e-6, rtol=1e-6)

    # 3) Non-128-multiple batch -> exercises the (bounded) padded path.
    x_mid = jax.random.normal(k_mid, (777, 3, 3), dtype=jnp.float32)
    out_mid = model_param_forward(x_mid, param, force_pallas=True)
    jax.block_until_ready(out_mid)
    assert jnp.allclose(out_mid, x_mid * param, atol=1e-6, rtol=1e-6)

    # 4) 128-multiple batch -> zero-copy reshape path (no pad, no slice).
    x_big = jax.random.normal(k_big, (2048, 3, 3), dtype=jnp.float32)
    out_big = model_param_forward(x_big, param, force_pallas=True)
    jax.block_until_ready(out_big)
    assert jnp.allclose(out_big, x_big * param, atol=1e-6, rtol=1e-6)

    print("KERNEL_OK")
</pallas_src>

<mosaic_0001>
module attributes {stable_mosaic.version = 11 : i64} {
  func.func @_mul_param_kernel(%arg0: i32, %arg1: memref<1x1152xf32, #tpu.memory_space<vmem>>, %arg2: memref<1x1152xf32, #tpu.memory_space<vmem>>, %arg3: memref<1x1152xf32, #tpu.memory_space<vmem>>) attributes {dimension_semantics = [#tpu.dimension_semantics<parallel>], iteration_bounds = array<i64: 1>, scalar_prefetch = 0 : i64, scratch_operands = 0 : i64, tpu.core_type = #tpu.core_type<tc>, window_params = [{transform_indices = @transform_0, window_bounds = array<i64: 1, 1152>}, {pipeline_mode = #tpu.pipeline_mode<synchronous>, transform_indices = @transform_1, window_bounds = array<i64: 1, 1152>}, {transform_indices = @transform_2, window_bounds = array<i64: 1, 1152>}]} {
    %c0 = arith.constant 0 : index
    %c0_0 = arith.constant 0 : index
    %0 = vector.load %arg1[%c0, %c0_0] : memref<1x1152xf32, #tpu.memory_space<vmem>>, vector<1x1152xf32>
    %c0_1 = arith.constant 0 : index
    %c0_2 = arith.constant 0 : index
    %1 = vector.load %arg2[%c0_1, %c0_2] : memref<1x1152xf32, #tpu.memory_space<vmem>>, vector<1x1152xf32>
    %2 = arith.mulf %0, %1 : vector<1x1152xf32>
    %c0_3 = arith.constant 0 : index
    %c0_4 = arith.constant 0 : index
    %3 = vector.load %arg3[%c0_3, %c0_4] : memref<1x1152xf32, #tpu.memory_space<vmem>>, vector<1x1152xf32>
    tpu.vector_store %arg3[%c0_3, %c0_4], %2 {strides = array<i32>} : memref<1x1152xf32, #tpu.memory_space<vmem>>, vector<1x1152xf32>,
    return
  }
  func.func @transform_0(%arg0: i32) -> (i32, i32) {
    %c0_i32 = arith.constant 0 : i32
    %c0_i32_0 = arith.constant 0 : i32
    return %arg0, %c0_i32 : i32, i32
  }
  func.func @transform_1(%arg0: i32) -> (i32, i32) {
    %c0_i32 = arith.constant 0 : i32
    %c0_i32_0 = arith.constant 0 : i32
    %c0_i32_1 = arith.constant 0 : i32
    return %c0_i32, %c0_i32_0 : i32, i32
  }
  func.func @transform_2(%arg0: i32) -> (i32, i32) {
    %c0_i32 = arith.constant 0 : i32
    %c0_i32_0 = arith.constant 0 : i32
    return %arg0, %c0_i32 : i32, i32
  }
}

</mosaic_0001>

<bundles_post_ra>
// kernel: tile.6
= control target key start
LH: loop header
LB: loop body
LE: loop exit
PB: predicated region body
PF: predicated region fallthrough
CT: control target
= control target key end

     0   :  { %s112_s0 = inlined_call_operand.vmem [shape: f32[9], index: 0, kind: input, shape index: {}]   ;;  %s113_s1 = inlined_call_operand.vmem [shape: f32[128,9], index: 1, kind: output, shape index: {}]  }
   0x1   :  { %v4_v0 = vld [vmem:[%s112_s0] ss:$0 sm:$0xff] }
   0x2   :  { %5 = vst [vmem:[%s113_s1] sm:$0xff] %v4_v0  ;;  %36 = vst [vmem:[%s113_s1 + $0x8] sm:$0xff] %v4_v0 }
   0x3   :  { %37 = vst [vmem:[%s113_s1 + $0x10] sm:$0xff] %v4_v0  ;;  %38 = vst [vmem:[%s113_s1 + $0x18] sm:$0xff] %v4_v0 }
   0x4   :  { %39 = vst [vmem:[%s113_s1 + $0x20] sm:$0xff] %v4_v0  ;;  %40 = vst [vmem:[%s113_s1 + $0x28] sm:$0xff] %v4_v0 }
   0x5   :  { %41 = vst [vmem:[%s113_s1 + $0x30] sm:$0xff] %v4_v0  ;;  %42 = vst [vmem:[%s113_s1 + $0x38] sm:$0xff] %v4_v0 }
   0x6   :  { %43 = vst [vmem:[%s113_s1 + $0x40] sm:$0xff] %v4_v0  ;;  %44 = vst [vmem:[%s113_s1 + $0x48] sm:$0xff] %v4_v0 }
   0x7   :  { %45 = vst [vmem:[%s113_s1 + $0x50] sm:$0xff] %v4_v0  ;;  %46 = vst [vmem:[%s113_s1 + $0x58] sm:$0xff] %v4_v0 }
   0x8   :  { %47 = vst [vmem:[%s113_s1 + $0x60] sm:$0xff] %v4_v0  ;;  %48 = vst [vmem:[%s113_s1 + $0x68] sm:$0xff] %v4_v0 }
   0x9   :  { %49 = vst [vmem:[%s113_s1 + $0x70] sm:$0xff] %v4_v0  ;;  %50 = vst [vmem:[%s113_s1 + $0x78] sm:$0xff] %v4_v0 }

// kernel: tile.5
= control target key start
LH: loop header
LB: loop body
LE: loop exit
PB: predicated region body
PF: predicated region fallthrough
CT: control target
= control target key end

     0   :  { %2 = vsyncpa [#allocation1], 0  ;;  %s65_s6 = smov [#allocation0]   ;;  %s93_s0 = inlined_call_operand.hbm [shape: f32[3,3], index: 0, kind: input, shape index: {}]   ;;  %s94_s1 = inlined_call_operand.vmem [shape: f32[9], index: 1, kind: output, shape index: {}]  }
   0x1   :  { %s7_s7 = sshll.u32 %s65_s6, 4  ;;  %s41_s10 = scalar_lea.hbm %s93_s0, 64  ;;  %s8_s7 = int_to_ptr.vmem [resolvable:$true] %s7_s7 }
   0x2   :  { %p42_p0 = scmp.ne.s32.totalorder %s93_s0, %s41_s10  ;;  %p45_p1 = scmp.lt.u32.totalorder %s41_s10, %s93_s0 }
   0x4   :  { %p47_p2 = pnand %p45_p1, %p42_p0 }
   0x6   :  { %50 = shalt.err (!%p47_p2)
}
   0x7   :  { %s51_s15 = scalar_lea.vmem %s8_s7, 64  ;;  %p56_p4 = scmp.lt.s32.totalorder %s8_s7, %s8_s7 }
   0x8   :  { %p52_p3 = scmp.ne.s32.totalorder %s8_s7, %s51_s15  ;;  %p57_p5 = scmp.lt.s32.totalorder %s51_s15, %s51_s15 }
   0xa   :  { %p58_p6 = por %p57_p5, %p56_p4 }
   0xc   :  { %p59_p7 = pnand %p58_p6, %p52_p3 }
   0xe   :  { %62 = shalt.err (!%p59_p7)
}
   0xf   :  { %10 = dma.hbm_to_vmem [thread:$0]  %s93_s0, 64, %s8_s7, [#allocation1]  }
  0x10   :  { %63 = dma.done.wait [#allocation1], 64  }
  0x11   :  { %64 = vsyncadd [#allocation1], 4294967232  ;;  %v14_v0 = vld [vmem:[#allocation0] sm:$0xf]  ;;  %vm17_vm0 = vcmask 23552   ;;  %s66_s0 = smov 6  }
  0x12   :  { %15 = vst [vmem:[#allocation3] sm:$0xf] %v14_v0  ;;  %s67_s18 = smov 3   ;;  %vm23_vm1 = vcmask 72752   ;;  %vm29_vm2 = vcmask 48152  }
  0x19   :  { %v20_v1 = vld [vmem:[#allocation3 + $0x2] sm:$0x1]   ;;  %v16_v2 = vld [vmem:[#allocation3] sm:$0x1]   ;;  %v26_v3 = vld [vmem:[#allocation3 + $0x1] sm:$0x1]  }
  0x1a   :  { %21 = vrot.lane.b32.xlu0 %v20_v1, %s66_s0  ;;  %18 = vst.msk [vmem:[#allocation2] sm:$0x1] %vm17_vm0, %v16_v2  }
  0x1e   :  { %27 = vrot.lane.b32.xlu0 %v26_v3, %s67_s18 }
  0x8c   :  { %v22_v4 = vpop.permute.xlu0 %21  }
  0x8d   :  { %24 = vst.msk [vmem:[#allocation2] sm:$0x1] %vm23_vm1, %v22_v4  }
  0x90   :  { %v28_v5 = vpop.permute.xlu0 %27  }
  0x91   :  { %30 = vst.msk [vmem:[#allocation2] sm:$0x1] %vm29_vm2, %v28_v5  }
  0x98   :  { %v34_v6 = vld [vmem:[#allocation2] sm:$0x1] }
  0x99   :  { %36 = vst [vmem:[%s94_s1] sm:$0x1] %v34_v6 }
  0x9a   :  { %37 = vsyncpa [#allocation1], 1 }

// kernel: tile.7
= control target key start
LH: loop header
LB: loop body
LE: loop exit
PB: predicated region body
PF: predicated region fallthrough
CT: control target
= control target key end

     0   :  { %vm9_vm0 = vcmask 7168   ;;  %vm36_vm1 = vcmask 23552   ;;  %s1266_s14 = smov 127   ;;  %vm23_vm2 = vcmask 15360   ;;  %s1267_s19 = smov 125   ;;  %vm50_vm3 = vcmask 31744   ;;  %s1854_s0 = inlined_call_operand.vmem [shape: f32[128,9], index: 0, kind: input, shape index: {}]   ;;  %s1855_s1 = inlined_call_operand.vmem [shape: f32[1,1152], index: 1, kind: output, shape index: {}]  }
   0x1   :  { %v996_v0 = vld [vmem:[%s1854_s0 + $0x47] sm:$0x1]   ;;  %v1000_v3 = vld [vmem:[%s1854_s0 + $0x55] sm:$0x1]   ;;  %v998_v6 = vld [vmem:[%s1854_s0 + $0xe] sm:$0x1]  }
   0x2   :  { %v997_v1 = vld [vmem:[%s1854_s0 + $0x47] sm:$0x1]   ;;  %v1001_v4 = vld [vmem:[%s1854_s0 + $0x55] sm:$0x1]   ;;  %v999_v7 = vld [vmem:[%s1854_s0 + $0xe] sm:$0x1]  }
   0x3   :  { %v10_v2 = vsel %vm9_vm0, %v997_v1, %v996_v0  ;;  %v37_v5 = vsel %vm36_vm1, %v1001_v4, %v1000_v3  ;;  %v24_v8 = vsel %vm23_vm2, %v999_v7, %v998_v6  ;;  %v1002_v9 = vld [vmem:[%s1854_s0 + $0x1c] sm:$0x1]   ;;  %vm54_vm4 = vcmask 39936   ;;  %v1004_v12 = vld [vmem:[%s1854_s0 + $0x63] sm:$0x1]   ;;  %s1268_s3 = smov 126  }
   0x4   :  { %11 = vrot.lane.b32.xlu0 %v10_v2, %s1266_s14  ;;  %38 = vrot.lane.b32.xlu1 %v37_v5, %s1267_s19  ;;  %v1003_v10 = vld [vmem:[%s1854_s0 + $0x1c] sm:$0x1]   ;;  %v1005_v13 = vld [vmem:[%s1854_s0 + $0x63] sm:$0x1]   ;;  %vm40_vm5 = vcmask 48128   ;;  %s1269_s4 = smov 124  }
   0x5   :  { %v51_v11 = vsel %vm50_vm3, %v1003_v10, %v1002_v9  ;;  %v1006_v14 = vld [vmem:[%s1854_s0 + $0x2a] sm:$0x1]   ;;  %v65_v16 = vsel %vm54_vm4, %v1005_v13, %v1004_v12  ;;  %vm27_vm6 = vcmask 56320   ;;  %v1008_v18 = vld [vmem:[%s1854_s0 + $0x71] sm:$0x1]   ;;  %vm13_vm7 = vcmask 64512  }
   0x6   :  { %v1007_v15 = vld [vmem:[%s1854_s0 + $0x2a] sm:$0x1]   ;;  %v1009_v19 = vld [vmem:[%s1854_s0 + $0x71] sm:$0x1]   ;;  %v1010_v20 = vld [vmem:[%s1854_s0 + $0x38] sm:$0x1]  }
   0x7   :  { %v79_v17 = vsel %vm40_vm5, %v1007_v15, %v1006_v14  ;;  %v1011_v21 = vld [vmem:[%s1854_s0 + $0x38] sm:$0x1]   ;;  %s1270_s13 = smov 123   ;;  %s1271_s14 = smov 122   ;;  %v93_v22 = vsel %vm27_vm6, %v1009_v19, %v1008_v18  ;;  %v1012_v24 = vld [vmem:[%s1854_s0 + $0x7f] sm:$0x1]  }
   0x8   :  { %25 = vrot.lane.b32.xlu0 %v24_v8, %s1268_s3  ;;  %52 = vrot.lane.b32.xlu1 %v51_v11, %s1269_s4  ;;  %v107_v23 = vsel %vm13_vm7, %v1011_v21, %v1010_v20  ;;  %s1272_s15 = smov 121   ;;  %s1273_s16 = smov 120   ;;  %v1013_v25 = vld [vmem:[%s1854_s0 + $0x46] sm:$0x1]   ;;  %v1014_v26 = vld [vmem:[%s1854_s0 + $0xd] sm:$0x1]  }
   0x9   :  { %s1274_s21 = smov 119   ;;  %s1275_s22 = smov 118   ;;  %v1015_v27 = vld [vmem:[%s1854_s0 + $0x54] sm:$0x1]   ;;  %v1016_v28 = vld [vmem:[%s1854_s0 + $0x1b] sm:$0x1]  }
   0xa   :  { %s1276_s27 = smov 117   ;;  %s1277_s28 = smov 116   ;;  %v1017_v29 = vld [vmem:[%s1854_s0 + $0x62] sm:$0x1]   ;;  %v1018_v30 = vld [vmem:[%s1854_s0 + $0x29] sm:$0x1]  }
   0xb   :  { %s1278_s4 = smov 115   ;;  %s1279_s5 = smov 114   ;;  %v1019_v31 = vld [vmem:[%s1854_s0 + $0x70] sm:$0x1]   ;;  %v1020_v32 = vld [vmem:[%s1854_s0 + $0x37] sm:$0x1]  }
   0xc   :  { %66 = vrot.lane.b32.xlu0 %v65_v16, %s1270_s13  ;;  %80 = vrot.lane.b32.xlu1 %v79_v17, %s1271_s14  ;;  %s1280_s10 = smov 113   ;;  %s1281_s11 = smov 112   ;;  %v1021_v33 = vld [vmem:[%s1854_s0 + $0x7e] sm:$0x1]   ;;  %v2_v34 = vld [vmem:[%s1854_s0] sm:$0x1]  }
   0xd   :  { %vm3_vm8 = vcmask 72704   ;;  %s1283_s19 = smov 110   ;;  %v1022_v35 = vld [vmem:[%s1854_s0 + $0x45] sm:$0x1]   ;;  %v1023_v36 = vld [vmem:[%s1854_s0 + $0xc] sm:$0x1]  }
   0xe   :  { %4 = vst.msk [vmem:[#allocation0] sm:$0x1] %vm3_vm8, %v2_v34   ;;  %s1284_s24 = smov 109   ;;  %s1285_s25 = smov 108   ;;  %v1024_v37 = vld [vmem:[%s1854_s0 + $0x53] sm:$0x1]  }
   0xf   :  { %v1025_v38 = vld [vmem:[%s1854_s0 + $0x1a] sm:$0x1]   ;;  %s1286_s30 = smov 107   ;;  %s1287_s2 = smov 106   ;;  %v1026_v39 = vld [vmem:[%s1854_s0 + $0x61] sm:$0x1]  }
  0x10   :  { %94 = vrot.lane.b32.xlu0 %v93_v22, %s1272_s15  ;;  %108 = vrot.lane.b32.xlu1 %v107_v23, %s1273_s16  ;;  %s1282_s16 = smov 111   ;;  %v1027_v40 = vld [vmem:[%s1854_s0 + $0x28] sm:$0x1]   ;;  %s1288_s7 = smov 105   ;;  %v1028_v41 = vld [vmem:[%s1854_s0 + $0x6f] sm:$0x1]  }
  0x11   :  { %s1289_s8 = smov 104   ;;  %v1029_v42 = vld [vmem:[%s1854_s0 + $0x36] sm:$0x1]   ;;  %s1290_s13 = smov 103   ;;  %v1030_v43 = vld [vmem:[%s1854_s0 + $0x7d] sm:$0x1]  }
  0x12   :  { %s1291_s14 = smov 102   ;;  %v1031_v44 = vld [vmem:[%s1854_s0 + $0x44] sm:$0x1]   ;;  %s1293_s20 = smov 100   ;;  %v1032_v45 = vld [vmem:[%s1854_s0 + $0xb] sm:$0x1]  }
  0x13   :  { %v1033_v46 = vld [vmem:[%s1854_s0 + $0x52] sm:$0x1]   ;;  %s1295_s26 = smov 98   ;;  %v1034_v47 = vld [vmem:[%s1854_s0 + $0x19] sm:$0x1]   ;;  %s1297_s3 = smov 96  }
  0x14   :  { %118 = vrot.lane.b32.xlu0 %v1012_v24, %s1274_s21  ;;  %125 = vrot.lane.b32.xlu1 %v1013_v25, %s1275_s22  ;;  %v1035_v48 = vld [vmem:[%s1854_s0 + $0x60] sm:$0x1]   ;;  %v1036_v49 = vld [vmem:[%s1854_s0 + $0x27] sm:$0x1]   ;;  %s1299_s9 = smov 94   ;;  %s1301_s15 = smov 92  }
  0x15   :  { %v1037_v50 = vld [vmem:[%s1854_s0 + $0x6e] sm:$0x1]   ;;  %v1038_v51 = vld [vmem:[%s1854_s0 + $0x35] sm:$0x1]   ;;  %v1039_v52 = vld [vmem:[%s1854_s0 + $0x7c] sm:$0x1]  }
  0x16   :  { %v1040_v53 = vld [vmem:[%s1854_s0 + $0x43] sm:$0x1]   ;;  %v1041_v54 = vld [vmem:[%s1854_s0 + $0xa] sm:$0x1]   ;;  %s1303_s21 = smov 90   ;;  %s1313_s22 = smov 80  }
  0x17   :  { %v1042_v55 = vld [vmem:[%s1854_s0 + $0x51] sm:$0x1]   ;;  %v1043_v56 = vld [vmem:[%s1854_s0 + $0x18] sm:$0x1]   ;;  %v1044_v57 = vld [vmem:[%s1854_s0 + $0x5f] sm:$0x1]  }
  0x18   :  { %132 = vrot.lane.b32.xlu0 %v1014_v26, %s1276_s27  ;;  %138 = vrot.lane.b32.xlu1 %v1015_v27, %s1277_s28  ;;  %s1305_s27 = smov 88   ;;  %v1045_v58 = vld [vmem:[%s1854_s0 + $0x26] sm:$0x1]   ;;  %v1046_v59 = vld [vmem:[%s1854_s0 + $0x6d] sm:$0x1]   ;;  %s1315_s28 = smov 78  }
  0x19   :  { %v1047_v60 = vld [vmem:[%s1854_s0 + $0x34] sm:$0x1]   ;;  %v1048_v61 = vld [vmem:[%s1854_s0 + $0x7b] sm:$0x1]   ;;  %v1049_v62 = vld [vmem:[%s1854_s0 + $0x42] sm:$0x1]  }
  0x1a   :  { %v1050_v63 = vld [vmem:[%s1854_s0 + $0x9] sm:$0x1]   ;;  %v1051_v0 = vld [vmem:[%s1854_s0 + $0x50] sm:$0x1]   ;;  %v1052_v1 = vld [vmem:[%s1854_s0 + $0x17] sm:$0x1]  }
  0x1b   :  { %v1053_v2 = vld [vmem:[%s1854_s0 + $0x5e] sm:$0x1]   ;;  %v1054_v3 = vld [vmem:[%s1854_s0 + $0x25] sm:$0x1]   ;;  %v1055_v4 = vld [vmem:[%s1854_s0 + $0x6c] sm:$0x1]  }
  0x1c   :  { %145 = vrot.lane.b32.xlu0 %v1016_v28, %s1278_s4  ;;  %152 = vrot.lane.b32.xlu1 %v1017_v29, %s1279_s5  ;;  %s1307_s4 = smov 86   ;;  %s1317_s5 = smov 76   ;;  %v1056_v5 = vld [vmem:[%s1854_s0 + $0x33] sm:$0x1]   ;;  %v1057_v6 = vld [vmem:[%s1854_s0 + $0x7a] sm:$0x1]  }
  0x1d   :  { %v1058_v7 = vld [vmem:[%s1854_s0 + $0x41] sm:$0x1]   ;;  %v1059_v8 = vld [vmem:[%s1854_s0 + $0x8] sm:$0x1]   ;;  %s1321_s17 = smov 72   ;;  %vm16_vm9 = vcmask 1048568  }
  0x1e   :  { %v1060_v9 = vld [vmem:[%s1854_s0 + $0x4f] sm:$0x1]   ;;  %v1061_v10 = vld [vmem:[%s1854_s0 + $0x16] sm:$0x1]   ;;  %s1323_s23 = smov 70   ;;  %vm43_vm10 = vcmask 1048552  }
  0x1f   :  { %v1062_v11 = vld [vmem:[%s1854_s0 + $0x5d] sm:$0x1]   ;;  %v1063_v13 = vld [vmem:[%s1854_s0 + $0x24] sm:$0x1]   ;;  %vm30_vm11 = vcmask 1048560   ;;  %s1325_s29 = smov 68  }
  0x20   :  { %159 = vrot.lane.b32.xlu0 %v1018_v30, %s1280_s10  ;;  %166 = vrot.lane.b32.xlu1 %v1019_v31, %s1281_s11  ;;  %s1309_s10 = smov 84   ;;  %s1319_s11 = smov 74   ;;  %v1064_v15 = vld [vmem:[%s1854_s0 + $0x6b] sm:$0x1]   ;;  %vm57_vm12 = vcmask 1048544   ;;  %vm71_vm13 = vcmask 1048536  }
  0x21   :  { %v1065_v17 = vld [vmem:[%s1854_s0 + $0x32] sm:$0x1]   ;;  %s1327_s6 = smov 66   ;;  %v1066_v19 = vld [vmem:[%s1854_s0 + $0x79] sm:$0x1]   ;;  %vm85_vm14 = vcmask 1048528  }
  0x22   :  { %v1067_v21 = vld [vmem:[%s1854_s0 + $0x40] sm:$0x1]   ;;  %vm99_vm15 = vcmask 1048520   ;;  %s1329_s12 = smov 64   ;;  %v1068_v23 = vld [vmem:[%s1854_s0 + $0x7] sm:$0x1]  }
  0x23   :  { %v1069_v25 = vld [vmem:[%s1854_s0 + $0x4e] sm:$0x1]   ;;  %s1331_s18 = smov 62   ;;  %v1070_v27 = vld [vmem:[%s1854_s0 + $0x15] sm:$0x1]   ;;  %vm168_vm8 = vcmask 991104  }
  0x24   :  { %173 = vrot.lane.b32.xlu0 %v1020_v32, %s1282_s16  ;;  %180 = vrot.lane.b32.xlu1 %v1021_v33, %s1283_s19  ;;  %s1292_s19 = smov 101   ;;  %s1311_s16 = smov 82   ;;  %v1071_v29 = vld [vmem:[%s1854_s0 + $0x5c] sm:$0x1]   ;;  %v1072_v31 = vld [vmem:[%s1854_s0 + $0x23] sm:$0x1]  }
  0x25   :  { %v1073_v33 = vld [vmem:[%s1854_s0 + $0x6a] sm:$0x1]  }
  0x28   :  { %187 = vrot.lane.b32.xlu0 %v1022_v35, %s1284_s24  ;;  %194 = vrot.lane.b32.xlu1 %v1023_v36, %s1285_s25  ;;  %s1294_s25 = smov 99   ;;  %s1333_s24 = smov 60   ;;  %v1074_v35 = vld [vmem:[%s1854_s0 + $0x31] sm:$0x1]  }
  0x2c   :  { %200 = vrot.lane.b32.xlu0 %v1024_v37, %s1286_s30  ;;  %207 = vrot.lane.b32.xlu1 %v1025_v38, %s1287_s2  ;;  %s1296_s2 = smov 97   ;;  %s1335_s30 = smov 58   ;;  %v1075_v37 = vld [vmem:[%s1854_s0 + $0x78] sm:$0x1]  }
  0x30   :  { %214 = vrot.lane.b32.xlu0 %v1026_v39, %s1288_s7  ;;  %221 = vrot.lane.b32.xlu1 %v1027_v40, %s1289_s8  ;;  %s1298_s8 = smov 95   ;;  %s1337_s7 = smov 56   ;;  %v1076_v39 = vld [vmem:[%s1854_s0 + $0x3f] sm:$0x1]  }
  0x34   :  { %228 = vrot.lane.b32.xlu0 %v1028_v41, %s1290_s13  ;;  %235 = vrot.lane.b32.xlu1 %v1029_v42, %s1291_s14  ;;  %s1300_s14 = smov 93   ;;  %v1077_v41 = vld [vmem:[%s1854_s0 + $0x6] sm:$0x1]   ;;  %s1339_s13 = smov 54  }
  0x38   :  { %242 = vrot.lane.b32.xlu0 %v1030_v43, %s1292_s19  ;;  %249 = vrot.lane.b32.xlu1 %v1031_v44, %s1293_s20  ;;  %s1302_s20 = smov 91   ;;  %v1078_v43 = vld [vmem:[%s1854_s0 + $0x4d] sm:$0x1]   ;;  %s1341_s19 = smov 52  }
  0x3c   :  { %256 = vrot.lane.b32.xlu0 %v1032_v45, %s1294_s25  ;;  %262 = vrot.lane.b32.xlu1 %v1033_v46, %s1295_s26  ;;  %s1304_s26 = smov 89   ;;  %v1079_v45 = vld [vmem:[%s1854_s0 + $0x14] sm:$0x1]   ;;  %s1343_s25 = smov 50  }
  0x40   :  { %269 = vrot.lane.b32.xlu0 %v1034_v47, %s1296_s2  ;;  %276 = vrot.lane.b32.xlu1 %v1035_v48, %s1297_s3  ;;  %s1306_s3 = smov 87   ;;  %v1080_v47 = vld [vmem:[%s1854_s0 + $0x5b] sm:$0x1]   ;;  %s1345_s2 = smov 48  }
  0x44   :  { %283 = vrot.lane.b32.xlu0 %v1036_v49, %s1298_s8  ;;  %290 = vrot.lane.b32.xlu1 %v1037_v50, %s1299_s9  ;;  %s1308_s9 = smov 85   ;;  %v1081_v49 = vld [vmem:[%s1854_s0 + $0x22] sm:$0x1]   ;;  %s1347_s8 = smov 46  }
  0x48   :  { %297 = vrot.lane.b32.xlu0 %v1038_v51, %s1300_s14  ;;  %304 = vrot.lane.b32.xlu1 %v1039_v52, %s1301_s15  ;;  %s1310_s15 = smov 83   ;;  %v1082_v51 = vld [vmem:[%s1854_s0 + $0x69] sm:$0x1]   ;;  %s1349_s14 = smov 44  }
  0x4c   :  { %311 = vrot.lane.b32.xlu0 %v1040_v53, %s1302_s20  ;;  %318 = vrot.lane.b32.xlu1 %v1041_v54, %s1303_s21  ;;  %s1312_s21 = smov 81   ;;  %v1083_v53 = vld [vmem:[%s1854_s0 + $0x30] sm:$0x1]   ;;  %s1351_s20 = smov 42  }
  0x50   :  { %324 = vrot.lane.b32.xlu0 %v1042_v55, %s1304_s26  ;;  %331 = vrot.lane.b32.xlu1 %v1043_v56, %s1305_s27  ;;  %s1314_s27 = smov 79   ;;  %v1084_v55 = vld [vmem:[%s1854_s0 + $0x77] sm:$0x1]   ;;  %s1353_s26 = smov 40  }
  0x54   :  { %338 = vrot.lane.b32.xlu0 %v1044_v57, %s1306_s3  ;;  %345 = vrot.lane.b32.xlu1 %v1045_v58, %s1307_s4  ;;  %s1316_s4 = smov 77   ;;  %v1085_v57 = vld [vmem:[%s1854_s0 + $0x3e] sm:$0x1]   ;;  %s1355_s3 = smov 38  }
  0x58   :  { %352 = vrot.lane.b32.xlu0 %v1046_v59, %s1308_s9  ;;  %359 = vrot.lane.b32.xlu1 %v1047_v60, %s1309_s10  ;;  %s1318_s10 = smov 75   ;;  %v1086_v59 = vld [vmem:[%s1854_s0 + $0x5] sm:$0x1]   ;;  %s1357_s9 = smov 36  }
  0x5c   :  { %366 = vrot.lane.b32.xlu0 %v1048_v61, %s1310_s15  ;;  %373 = vrot.lane.b32.xlu1 %v1049_v62, %s1311_s16  ;;  %s1320_s16 = smov 73   ;;  %v1087_v61 = vld [vmem:[%s1854_s0 + $0x4c] sm:$0x1]   ;;  %s1359_s15 = smov 34  }
  0x60   :  { %380 = vrot.lane.b32.xlu0 %v1050_v63, %s1312_s21  ;;  %386 = vrot.lane.b32.xlu1 %v1051_v0, %s1313_s22  ;;  %s1322_s22 = smov 71   ;;  %v1088_v63 = vld [vmem:[%s1854_s0 + $0x13] sm:$0x1]   ;;  %s1361_s21 = smov 32  }
  0x64   :  { %393 = vrot.lane.b32.xlu0 %v1052_v1, %s1314_s27  ;;  %400 = vrot.lane.b32.xlu1 %v1053_v2, %s1315_s28  ;;  %s1324_s28 = smov 69   ;;  %v1089_v1 = vld [vmem:[%s1854_s0 + $0x5a] sm:$0x1]   ;;  %s1363_s27 = smov 30  }
  0x68   :  { %407 = vrot.lane.b32.xlu0 %v1054_v3, %s1316_s4  ;;  %414 = vrot.lane.b32.xlu1 %v1055_v4, %s1317_s5  ;;  %s1326_s5 = smov 67   ;;  %v1090_v3 = vld [vmem:[%s1854_s0 + $0x21] sm:$0x1]   ;;  %s1365_s4 = smov 28  }
  0x6c   :  { %421 = vrot.lane.b32.xlu0 %v1056_v5, %s1318_s10  ;;  %428 = vrot.lane.b32.xlu1 %v1057_v6, %s1319_s11  ;;  %s1328_s11 = smov 65   ;;  %v1091_v5 = vld [vmem:[%s1854_s0 + $0x68] sm:$0x1]   ;;  %s1367_s10 = smov 26  }
  0x70   :  { %435 = vrot.lane.b32.xlu0 %v1058_v7, %s1320_s16  ;;  %442 = vrot.lane.b32.xlu1 %v1059_v8, %s1321_s17  ;;  %s1330_s17 = smov 63   ;;  %v1092_v7 = vld [vmem:[%s1854_s0 + $0x2f] sm:$0x1]   ;;  %s1369_s16 = smov 24  }
  0x74   :  { %448 = vrot.lane.b32.xlu0 %v1060_v9, %s1322_s22  ;;  %455 = vrot.lane.b32.xlu1 %v1061_v10, %s1323_s23  ;;  %s1332_s23 = smov 61   ;;  %v1093_v9 = vld [vmem:[%s1854_s0 + $0x76] sm:$0x1]   ;;  %s1371_s22 = smov 22  }
  0x76   :  { %v12_v12 = vpop.permute.xlu0 %11   ;;  %v39_v14 = vpop.permute.xlu1 %38  }
  0x77   :  { %15 = vst.msk [vmem:[#allocation0 + $0x28] sm:$0x1] %vm13_vm7, %v12_v12   ;;  %vm161_vm7 = vcmask 999304  }
  0x78   :  { %18 = vst.msk [vmem:[#allocation0 + $0x20] sm:$0x1] %vm16_vm9, %v12_v12   ;;  %462 = vrot.lane.b32.xlu0 %v1062_v11, %s1324_s28  ;;  %469 = vrot.lane.b32.xlu1 %v1063_v13, %s1325_s29  ;;  %s1334_s29 = smov 59   ;;  %vm175_vm9 = vcmask 982904   ;;  %v1094_v11 = vld [vmem:[%s1854_s0 + $0x3d] sm:$0x1]  }
  0x79   :  { %42 = vst.msk [vmem:[#allocation0 + $0x30] sm:$0x1] %vm40_vm5, %v39_v14   ;;  %vm147_vm5 = vcmask 1015704   ;;  %v1095_v13 = vld [vmem:[%s1854_s0 + $0x4] sm:$0x1]   ;;  %s1373_s28 = smov 20  }
  0x7a   :  { %45 = vst.msk [vmem:[#allocation0 + $0x28] sm:$0x1] %vm43_vm10, %v39_v14   ;;  %v26_v16 = vpop.permute.xlu0 %25   ;;  %v53_v18 = vpop.permute.xlu1 %52   ;;  %vm182_vm10 = vcmask 974704  }
  0x7b   :  { %29 = vst.msk [vmem:[#allocation0 + $0x8] sm:$0x1] %vm27_vm6, %v26_v16   ;;  %vm154_vm6 = vcmask 1007504  }
  0x7c   :  { %31 = vst.msk [vmem:[#allocation0] sm:$0x1] %vm30_vm11, %v26_v16   ;;  %476 = vrot.lane.b32.xlu0 %v1064_v15, %s1326_s5  ;;  %483 = vrot.lane.b32.xlu1 %v1065_v17, %s1327_s6  ;;  %s1336_s6 = smov 57   ;;  %vm189_vm11 = vcmask 966504   ;;  %v1096_v15 = vld [vmem:[%s1854_s0 + $0x4b] sm:$0x1]  }
  0x7d   :  { %56 = vst.msk [vmem:[#allocation0 + $0x10] sm:$0x1] %vm54_vm4, %v53_v18   ;;  %vm140_vm4 = vcmask 1023904   ;;  %v1097_v17 = vld [vmem:[%s1854_s0 + $0x12] sm:$0x1]   ;;  %s1375_s5 = smov 18  }
  0x7e   :  { %59 = vst.msk [vmem:[#allocation0 + $0x8] sm:$0x1] %vm57_vm12, %v53_v18   ;;  %v67_v20 = vpop.permute.xlu0 %66   ;;  %v81_v22 = vpop.permute.xlu1 %80   ;;  %vm196_vm12 = vcmask 958304  }
  0x7f   :  { %70 = vst.msk [vmem:[#allocation0 + $0x38] sm:$0x1] %vm50_vm3, %v67_v20   ;;  %vm134_vm3 = vcmask 1032104  }
  0x80   :  { %73 = vst.msk [vmem:[#allocation0 + $0x30] sm:$0x1] %vm71_vm13, %v67_v20   ;;  %490 = vrot.lane.b32.xlu0 %v1066_v19, %s1328_s11  ;;  %497 = vrot.lane.b32.xlu1 %v1067_v21, %s1329_s12  ;;  %s1338_s12 = smov 55   ;;  %vm202_vm13 = vcmask 950104   ;;  %v1098_v19 = vld [vmem:[%s1854_s0 + $0x59] sm:$0x1]  }
  0x81   :  { %84 = vst.msk [vmem:[#allocation0 + $0x18] sm:$0x1] %vm36_vm1, %v81_v22   ;;  %vm113_vm1 = vcmask 1048512   ;;  %v1099_v21 = vld [vmem:[%s1854_s0 + $0x20] sm:$0x1]   ;;  %s1377_s11 = smov 16  }
  0x82   :  { %87 = vst.msk [vmem:[#allocation0 + $0x10] sm:$0x1] %vm85_vm14, %v81_v22   ;;  %v95_v24 = vpop.permute.xlu0 %94   ;;  %v109_v26 = vpop.permute.xlu1 %108   ;;  %vm209_vm14 = vcmask 941904  }
  0x83   :  { %98 = vst.msk [vmem:[#allocation0 + $0x40] sm:$0x1] %vm23_vm2, %v95_v24   ;;  %vm127_vm2 = vcmask 1040304  }
  0x84   :  { %101 = vst.msk [vmem:[#allocation0 + $0x38] sm:$0x1] %vm99_vm15, %v95_v24   ;;  %504 = vrot.lane.b32.xlu0 %v1068_v23, %s1330_s17  ;;  %510 = vrot.lane.b32.xlu1 %v1069_v25, %s1331_s18  ;;  %s1340_s18 = smov 53   ;;  %vm216_vm15 = vcmask 933704   ;;  %v1100_v23 = vld [vmem:[%s1854_s0 + $0x67] sm:$0x1]  }
  0x85   :  { %112 = vst.msk [vmem:[#allocation0 + $0x20] sm:$0x1] %vm9_vm0, %v109_v26   ;;  %vm120_vm0 = vcmask 1048504   ;;  %v1101_v25 = vld [vmem:[%s1854_s0 + $0x2e] sm:$0x1]   ;;  %s1379_s17 = smov 14  }
  0x86   :  { %115 = vst.msk [vmem:[#allocation0 + $0x18] sm:$0x1] %vm113_vm1, %v109_v26   ;;  %v119_v28 = vpop.permute.xlu0 %118   ;;  %v126_v30 = vpop.permute.xlu1 %125   ;;  %vm223_vm1 = vcmask 925504  }
  0x87   :  { %122 = vst.msk [vmem:[#allocation0 + $0x40] sm:$0x1] %vm120_vm0, %v119_v28   ;;  %vm230_vm0 = vcmask 917304  }
  0x88   :  { %517 = vrot.lane.b32.xlu0 %v1070_v27, %s1332_s23  ;;  %129 = vst.msk [vmem:[#allocation0 + $0x20] sm:$0x1] %vm127_vm2, %v126_v30   ;;  %524 = vrot.lane.b32.xlu1 %v1071_v29, %s1333_s24  ;;  %s1342_s24 = smov 51   ;;  %vm237_vm2 = vcmask 909104   ;;  %v1102_v27 = vld [vmem:[%s1854_s0 + $0x75] sm:$0x1]  }
  0x89   :  { %v1103_v29 = vld [vmem:[%s1854_s0 + $0x3c] sm:$0x1]   ;;  %s1381_s23 = smov 12  }
  0x8a   :  { %v133_v32 = vpop.permute.xlu0 %132   ;;  %v139_v34 = vpop.permute.xlu1 %138  }
  0x8b   :  { %135 = vst.msk [vmem:[#allocation0] sm:$0x1] %vm134_vm3, %v133_v32   ;;  %vm244_vm3 = vcmask 900904  }
  0x8c   :  { %531 = vrot.lane.b32.xlu0 %v1072_v31, %s1334_s29  ;;  %142 = vst.msk [vmem:[#allocation0 + $0x28] sm:$0x1] %vm140_vm4, %v139_v34   ;;  %538 = vrot.lane.b32.xlu1 %v1073_v33, %s1335_s30  ;;  %s1344_s30 = smov 49   ;;  %vm251_vm4 = vcmask 892704   ;;  %v1104_v31 = vld [vmem:[%s1854_s0 + $0x3] sm:$0x1]  }
  0x8d   :  { %v1105_v33 = vld [vmem:[%s1854_s0 + $0x4a] sm:$0x1]   ;;  %s1383_s29 = smov 10  }
  0x8e   :  { %v146_v36 = vpop.permute.xlu0 %145   ;;  %v153_v38 = vpop.permute.xlu1 %152  }
  0x8f   :  { %149 = vst.msk [vmem:[#allocation0 + $0x8] sm:$0x1] %vm147_vm5, %v146_v36   ;;  %vm258_vm5 = vcmask 884504  }
  0x90   :  { %545 = vrot.lane.b32.xlu0 %v1074_v35, %s1336_s6  ;;  %156 = vst.msk [vmem:[#allocation0 + $0x30] sm:$0x1] %vm154_vm6, %v153_v38   ;;  %552 = vrot.lane.b32.xlu1 %v1075_v37, %s1337_s7  ;;  %s1346_s7 = smov 47   ;;  %vm264_vm6 = vcmask 876304   ;;  %v1106_v35 = vld [vmem:[%s1854_s0 + $0x11] sm:$0x1]  }
  0x91   :  { %v1107_v37 = vld [vmem:[%s1854_s0 + $0x58] sm:$0x1]   ;;  %s1385_s6 = smov 8  }
  0x92   :  { %v160_v40 = vpop.permute.xlu0 %159   ;;  %v167_v42 = vpop.permute.xlu1 %166  }
  0x93   :  { %163 = vst.msk [vmem:[#allocation0 + $0x10] sm:$0x1] %vm161_vm7, %v160_v40   ;;  %vm271_vm7 = vcmask 868104  }
  0x94   :  { %559 = vrot.lane.b32.xlu0 %v1076_v39, %s1338_s12  ;;  %170 = vst.msk [vmem:[#allocation0 + $0x38] sm:$0x1] %vm168_vm8, %v167_v42   ;;  %566 = vrot.lane.b32.xlu1 %v1077_v41, %s1339_s13  ;;  %s1348_s13 = smov 45   ;;  %vm278_vm8 = vcmask 859904   ;;  %v1108_v39 = vld [vmem:[%s1854_s0 + $0x1f] sm:$0x1]  }
  0x95   :  { %v1109_v41 = vld [vmem:[%s1854_s0 + $0x66] sm:$0x1]   ;;  %s1387_s12 = smov 6  }
  0x96   :  { %v174_v44 = vpop.permute.xlu0 %173   ;;  %v181_v46 = vpop.permute.xlu1 %180  }
  0x97   :  { %177 = vst.msk [vmem:[#allocation0 + $0x18] sm:$0x1] %vm175_vm9, %v174_v44   ;;  %vm285_vm9 = vcmask 851704  }
  0x98   :  { %572 = vrot.lane.b32.xlu0 %v1078_v43, %s1340_s18  ;;  %184 = vst.msk [vmem:[#allocation0 + $0x40] sm:$0x1] %vm182_vm10, %v181_v46   ;;  %579 = vrot.lane.b32.xlu1 %v1079_v45, %s1341_s19  ;;  %s1350_s19 = smov 43   ;;  %vm292_vm10 = vcmask 843504   ;;  %v1110_v43 = vld [vmem:[%s1854_s0 + $0x2d] sm:$0x1]  }
  0x99   :  { %v1111_v45 = vld [vmem:[%s1854_s0 + $0x74] sm:$0x1]   ;;  %s1389_s18 = smov 4  }
  0x9a   :  { %v188_v48 = vpop.permute.xlu0 %187   ;;  %v195_v50 = vpop.permute.xlu1 %194  }
  0x9b   :  { %191 = vst.msk [vmem:[#allocation0 + $0x20] sm:$0x1] %vm189_vm11, %v188_v48   ;;  %vm299_vm11 = vcmask 835304  }
  0x9c   :  { %586 = vrot.lane.b32.xlu0 %v1080_v47, %s1342_s24  ;;  %197 = vst.msk [vmem:[#allocation0] sm:$0x1] %vm196_vm12, %v195_v50   ;;  %593 = vrot.lane.b32.xlu1 %v1081_v49, %s1343_s25  ;;  %s1352_s25 = smov 41   ;;  %vm306_vm12 = vcmask 827104   ;;  %v1112_v47 = vld [vmem:[%s1854_s0 + $0x3b] sm:$0x1]  }
  0x9d   :  { %v1113_v49 = vld [vmem:[%s1854_s0 + $0x2] sm:$0x1]   ;;  %s1391_s24 = smov 2  }
  0x9e   :  { %v201_v52 = vpop.permute.xlu0 %200   ;;  %v208_v54 = vpop.permute.xlu1 %207  }
  0x9f   :  { %204 = vst.msk [vmem:[#allocation0 + $0x28] sm:$0x1] %vm202_vm13, %v201_v52   ;;  %vm313_vm13 = vcmask 818904  }
  0xa0   :  { %600 = vrot.lane.b32.xlu0 %v1082_v51, %s1344_s30  ;;  %211 = vst.msk [vmem:[#allocation0 + $0x8] sm:$0x1] %vm209_vm14, %v208_v54   ;;  %607 = vrot.lane.b32.xlu1 %v1083_v53, %s1345_s2  ;;  %s1354_s2 = smov 39   ;;  %vm320_vm14 = vcmask 810704   ;;  %v1114_v51 = vld [vmem:[%s1854_s0 + $0x49] sm:$0x1]  }
  0xa1   :  { %v1115_v53 = vld [vmem:[%s1854_s0 + $0x10] sm:$0x1]  }
  0xa2   :  { %v215_v56 = vpop.permute.xlu0 %214   ;;  %v222_v58 = vpop.permute.xlu1 %221  }
  0xa3   :  { %218 = vst.msk [vmem:[#allocation0 + $0x30] sm:$0x1] %vm216_vm15, %v215_v56   ;;  %vm326_vm15 = vcmask 802504  }
  0xa4   :  { %614 = vrot.lane.b32.xlu0 %v1084_v55, %s1346_s7  ;;  %225 = vst.msk [vmem:[#allocation0 + $0x10] sm:$0x1] %vm223_vm1, %v222_v58   ;;  %621 = vrot.lane.b32.xlu1 %v1085_v57, %s1347_s8  ;;  %s1356_s8 = smov 37   ;;  %vm333_vm1 = vcmask 794304   ;;  %v1116_v55 = vld [vmem:[%s1854_s0 + $0x57] sm:$0x1]  }
  0xa5   :  { %v1117_v57 = vld [vmem:[%s1854_s0 + $0x1e] sm:$0x1]  }
  0xa6   :  { %v229_v60 = vpop.permute.xlu0 %228   ;;  %v236_v62 = vpop.permute.xlu1 %235  }
  0xa7   :  { %232 = vst.msk [vmem:[#allocation0 + $0x38] sm:$0x1] %vm230_vm0, %v229_v60   ;;  %vm340_vm0 = vcmask 786104  }
  0xa8   :  { %628 = vrot.lane.b32.xlu0 %v1086_v59, %s1348_s13  ;;  %239 = vst.msk [vmem:[#allocation0 + $0x18] sm:$0x1] %vm237_vm2, %v236_v62   ;;  %634 = vrot.lane.b32.xlu1 %v1087_v61, %s1349_s14  ;;  %s1358_s14 = smov 35   ;;  %vm347_vm2 = vcmask 777904   ;;  %v1118_v59 = vld [vmem:[%s1854_s0 + $0x65] sm:$0x1]  }
  0xa9   :  { %v1119_v61 = vld [vmem:[%s1854_s0 + $0x2c] sm:$0x1]  }
  0xaa   :  { %v243_v0 = vpop.permute.xlu0 %242   ;;  %v250_v2 = vpop.permute.xlu1 %249  }
  0xab   :  { %246 = vst.msk [vmem:[#allocation0 + $0x40] sm:$0x1] %vm244_vm3, %v243_v0   ;;  %vm354_vm3 = vcmask 769704  }
  0xac   :  { %641 = vrot.lane.b32.xlu0 %v1088_v63, %s1350_s19  ;;  %253 = vst.msk [vmem:[#allocation0 + $0x20] sm:$0x1] %vm251_vm4, %v250_v2   ;;  %648 = vrot.lane.b32.xlu1 %v1089_v1, %s1351_s20  ;;  %s1360_s20 = smov 33   ;;  %vm361_vm4 = vcmask 761504   ;;  %v1120_v63 = vld [vmem:[%s1854_s0 + $0x73] sm:$0x1]  }
  0xad   :  { %v1121_v1 = vld [vmem:[%s1854_s0 + $0x3a] sm:$0x1]  }
  0xae   :  { %v257_v4 = vpop.permute.xlu0 %256   ;;  %v263_v6 = vpop.permute.xlu1 %262  }
  0xaf   :  { %259 = vst.msk [vmem:[#allocation0] sm:$0x1] %vm258_vm5, %v257_v4   ;;  %vm368_vm5 = vcmask 753304  }
  0xb0   :  { %655 = vrot.lane.b32.xlu0 %v1090_v3, %s1352_s25  ;;  %266 = vst.msk [vmem:[#allocation0 + $0x28] sm:$0x1] %vm264_vm6, %v263_v6   ;;  %662 = vrot.lane.b32.xlu1 %v1091_v5, %s1353_s26  ;;  %s1362_s26 = smov 31   ;;  %vm375_vm6 = vcmask 745104   ;;  %v1122_v3 = vld [vmem:[%s1854_s0 + $0x1] sm:$0x1]  }
  0xb1   :  { %v1123_v5 = vld [vmem:[%s1854_s0 + $0x48] sm:$0x1]  }
  0xb2   :  { %v270_v8 = vpop.permute.xlu0 %269   ;;  %v277_v10 = vpop.permute.xlu1 %276  }
  0xb3   :  { %273 = vst.msk [vmem:[#allocation0 + $0x8] sm:$0x1] %vm271_vm7, %v270_v8   ;;  %vm382_vm7 = vcmask 736904  }
  0xb4   :  { %669 = vrot.lane.b32.xlu0 %v1092_v7, %s1354_s2  ;;  %280 = vst.msk [vmem:[#allocation0 + $0x30] sm:$0x1] %vm278_vm8, %v277_v10   ;;  %676 = vrot.lane.b32.xlu1 %v1093_v9, %s1355_s3  ;;  %s1364_s3 = smov 29   ;;  %vm388_vm8 = vcmask 728704   ;;  %v1124_v7 = vld [vmem:[%s1854_s0 + $0xf] sm:$0x1]  }
  0xb5   :  { %v1125_v9 = vld [vmem:[%s1854_s0 + $0x56] sm:$0x1]  }
  0xb6   :  { %v284_v12 = vpop.permute.xlu0 %283   ;;  %v291_v14 = vpop.permute.xlu1 %290  }
  0xb7   :  { %287 = vst.msk [vmem:[#allocation0 + $0x10] sm:$0x1] %vm285_vm9, %v284_v12   ;;  %vm395_vm9 = vcmask 720504  }
  0xb8   :  { %683 = vrot.lane.b32.xlu0 %v1094_v11, %s1356_s8  ;;  %294 = vst.msk [vmem:[#allocation0 + $0x38] sm:$0x1] %vm292_vm10, %v291_v14   ;;  %690 = vrot.lane.b32.xlu1 %v1095_v13, %s1357_s9  ;;  %s1366_s9 = smov 27   ;;  %vm402_vm10 = vcmask 712304   ;;  %v1126_v11 = vld [vmem:[%s1854_s0 + $0x1d] sm:$0x1]  }
  0xb9   :  { %v1127_v13 = vld [vmem:[%s1854_s0 + $0x64] sm:$0x1]  }
  0xba   :  { %v298_v16 = vpop.permute.xlu0 %297   ;;  %v305_v18 = vpop.permute.xlu1 %304  }
  0xbb   :  { %301 = vst.msk [vmem:[#allocation0 + $0x18] sm:$0x1] %vm299_vm11, %v298_v16   ;;  %vm409_vm11 = vcmask 704104  }
  0xbc   :  { %696 = vrot.lane.b32.xlu0 %v1096_v15, %s1358_s14  ;;  %308 = vst.msk [vmem:[#allocation0 + $0x40] sm:$0x1] %vm306_vm12, %v305_v18   ;;  %703 = vrot.lane.b32.xlu1 %v1097_v17, %s1359_s15  ;;  %s1368_s15 = smov 25   ;;  %vm416_vm12 = vcmask 695904   ;;  %v1128_v15 = vld [vmem:[%s1854_s0 + $0x2b] sm:$0x1]  }
  0xbd   :  { %v1129_v17 = vld [vmem:[%s1854_s0 + $0x72] sm:$0x1]  }
  0xbe   :  { %v312_v20 = vpop.permute.xlu0 %311   ;;  %v319_v22 = vpop.permute.xlu1 %318  }
  0xbf   :  { %315 = vst.msk [vmem:[#allocation0 + $0x20] sm:$0x1] %vm313_vm13, %v312_v20   ;;  %vm423_vm13 = vcmask 687704  }
  0xc0   :  { %710 = vrot.lane.b32.xlu0 %v1098_v19, %s1360_s20  ;;  %321 = vst.msk [vmem:[#allocation0] sm:$0x1] %vm320_vm14, %v319_v22   ;;  %717 = vrot.lane.b32.xlu1 %v1099_v21, %s1361_s21  ;;  %s1370_s21 = smov 23   ;;  %vm430_vm14 = vcmask 679504   ;;  %v1130_v19 = vld [vmem:[%s1854_s0 + $0x39] sm:$0x1]  }
  0xc1   :  { %s1392_s0 = smov 1  }
  0xc2   :  { %v325_v24 = vpop.permute.xlu0 %324   ;;  %v332_v26 = vpop.permute.xlu1 %331  }
  0xc3   :  { %328 = vst.msk [vmem:[#allocation0 + $0x28] sm:$0x1] %vm326_vm15, %v325_v24   ;;  %vm437_vm15 = vcmask 671304  }
  0xc4   :  { %724 = vrot.lane.b32.xlu0 %v1100_v23, %s1362_s26  ;;  %335 = vst.msk [vmem:[#allocation0 + $0x8] sm:$0x1] %vm333_vm1, %v332_v26   ;;  %731 = vrot.lane.b32.xlu1 %v1101_v25, %s1363_s27  ;;  %s1372_s27 = smov 21   ;;  %vm444_vm1 = vcmask 663104  }
  0xc6   :  { %v339_v28 = vpop.permute.xlu0 %338   ;;  %v346_v30 = vpop.permute.xlu1 %345  }
  0xc7   :  { %342 = vst.msk [vmem:[#allocation0 + $0x30] sm:$0x1] %vm340_vm0, %v339_v28   ;;  %vm450_vm0 = vcmask 654904  }
  0xc8   :  { %738 = vrot.lane.b32.xlu0 %v1102_v27, %s1364_s3  ;;  %349 = vst.msk [vmem:[#allocation0 + $0x10] sm:$0x1] %vm347_vm2, %v346_v30   ;;  %745 = vrot.lane.b32.xlu1 %v1103_v29, %s1365_s4  ;;  %s1374_s4 = smov 19   ;;  %vm457_vm2 = vcmask 646704  }
  0xca   :  { %v353_v32 = vpop.permute.xlu0 %352   ;;  %v360_v34 = vpop.permute.xlu1 %359  }
  0xcb   :  { %356 = vst.msk [vmem:[#allocation0 + $0x38] sm:$0x1] %vm354_vm3, %v353_v32   ;;  %vm464_vm3 = vcmask 638504  }
  0xcc   :  { %752 = vrot.lane.b32.xlu0 %v1104_v31, %s1366_s9  ;;  %363 = vst.msk [vmem:[#allocation0 + $0x18] sm:$0x1] %vm361_vm4, %v360_v34   ;;  %758 = vrot.lane.b32.xlu1 %v1105_v33, %s1367_s10  ;;  %s1376_s10 = smov 17   ;;  %vm471_vm4 = vcmask 630304  }
  0xce   :  { %v367_v36 = vpop.permute.xlu0 %366   ;;  %v374_v38 = vpop.permute.xlu1 %373  }
  0xcf   :  { %370 = vst.msk [vmem:[#allocation0 + $0x40] sm:$0x1] %vm368_vm5, %v367_v36   ;;  %vm478_vm5 = vcmask 622104  }
  0xd0   :  { %765 = vrot.lane.b32.xlu0 %v1106_v35, %s1368_s15  ;;  %377 = vst.msk [vmem:[#allocation0 + $0x20] sm:$0x1] %vm375_vm6, %v374_v38   ;;  %772 = vrot.lane.b32.xlu1 %v1107_v37, %s1369_s16  ;;  %s1378_s16 = smov 15   ;;  %vm485_vm6 = vcmask 613904  }
  0xd2   :  { %v381_v40 = vpop.permute.xlu0 %380   ;;  %v387_v42 = vpop.permute.xlu1 %386  }
  0xd3   :  { %383 = vst.msk [vmem:[#allocation0] sm:$0x1] %vm382_vm7, %v381_v40   ;;  %vm492_vm7 = vcmask 605704  }
  0xd4   :  { %779 = vrot.lane.b32.xlu0 %v1108_v39, %s1370_s21  ;;  %390 = vst.msk [vmem:[#allocation0 + $0x28] sm:$0x1] %vm388_vm8, %v387_v42   ;;  %786 = vrot.lane.b32.xlu1 %v1109_v41, %s1371_s22  ;;  %s1380_s22 = smov 13   ;;  %vm499_vm8 = vcmask 597504  }
  0xd6   :  { %v394_v44 = vpop.permute.xlu0 %393   ;;  %v401_v46 = vpop.permute.xlu1 %400  }
  0xd7   :  { %397 = vst.msk [vmem:[#allocation0 + $0x8] sm:$0x1] %vm395_vm9, %v394_v44   ;;  %vm506_vm9 = vcmask 589304  }
  0xd8   :  { %793 = vrot.lane.b32.xlu0 %v1110_v43, %s1372_s27  ;;  %404 = vst.msk [vmem:[#allocation0 + $0x30] sm:$0x1] %vm402_vm10, %v401_v46   ;;  %800 = vrot.lane.b32.xlu1 %v1111_v45, %s1373_s28  ;;  %s1382_s28 = smov 11   ;;  %vm512_vm10 = vcmask 581104  }
  0xda   :  { %v408_v48 = vpop.permute.xlu0 %407   ;;  %v415_v50 = vpop.permute.xlu1 %414  }
  0xdb   :  { %411 = vst.msk [vmem:[#allocation0 + $0x10] sm:$0x1] %vm409_vm11, %v408_v48   ;;  %vm519_vm11 = vcmask 572904  }
  0xdc   :  { %807 = vrot.lane.b32.xlu0 %v1112_v47, %s1374_s4  ;;  %418 = vst.msk [vmem:[#allocation0 + $0x38] sm:$0x1] %vm416_vm12, %v415_v50   ;;  %814 = vrot.lane.b32.xlu1 %v1113_v49, %s1375_s5  ;;  %s1384_s5 = smov 9   ;;  %vm526_vm12 = vcmask 564704  }
  0xde   :  { %v422_v52 = vpop.permute.xlu0 %421   ;;  %v429_v54 = vpop.permute.xlu1 %428  }
  0xdf   :  { %425 = vst.msk [vmem:[#allocation0 + $0x18] sm:$0x1] %vm423_vm13, %v422_v52   ;;  %vm533_vm13 = vcmask 556504  }
  0xe0   :  { %820 = vrot.lane.b32.xlu0 %v1114_v51, %s1376_s10  ;;  %432 = vst.msk [vmem:[#allocation0 + $0x40] sm:$0x1] %vm430_vm14, %v429_v54   ;;  %827 = vrot.lane.b32.xlu1 %v1115_v53, %s1377_s11  ;;  %s1386_s11 = smov 7   ;;  %vm540_vm14 = vcmask 548304  }
  0xe2   :  { %v436_v56 = vpop.permute.xlu0 %435   ;;  %v443_v58 = vpop.permute.xlu1 %442  }
  0xe3   :  { %439 = vst.msk [vmem:[#allocation0 + $0x20] sm:$0x1] %vm437_vm15, %v436_v56   ;;  %vm547_vm15 = vcmask 540104  }
  0xe4   :  { %834 = vrot.lane.b32.xlu0 %v1116_v55, %s1378_s16  ;;  %445 = vst.msk [vmem:[#allocation0] sm:$0x1] %vm444_vm1, %v443_v58   ;;  %841 = vrot.lane.b32.xlu1 %v1117_v57, %s1379_s17  ;;  %s1388_s17 = smov 5   ;;  %vm554_vm1 = vcmask 531904  }
  0xe6   :  { %v449_v60 = vpop.permute.xlu0 %448   ;;  %v456_v62 = vpop.permute.xlu1 %455  }
  0xe7   :  { %452 = vst.msk [vmem:[#allocation0 + $0x28] sm:$0x1] %vm450_vm0, %v449_v60   ;;  %vm561_vm0 = vcmask 523704  }
  0xe8   :  { %848 = vrot.lane.b32.xlu0 %v1118_v59, %s1380_s22  ;;  %459 = vst.msk [vmem:[#allocation0 + $0x8] sm:$0x1] %vm457_vm2, %v456_v62   ;;  %855 = vrot.lane.b32.xlu1 %v1119_v61, %s1381_s23  ;;  %s1390_s23 = smov 3   ;;  %vm568_vm2 = vcmask 515504  }
  0xea   :  { %v463_v0 = vpop.permute.xlu0 %462   ;;  %v470_v2 = vpop.permute.xlu1 %469  }
  0xeb   :  { %466 = vst.msk [vmem:[#allocation0 + $0x30] sm:$0x1] %vm464_vm3, %v463_v0   ;;  %vm574_vm3 = vcmask 507304  }
  0xec   :  { %862 = vrot.lane.b32.xlu0 %v1120_v63, %s1382_s28  ;;  %473 = vst.msk [vmem:[#allocation0 + $0x10] sm:$0x1] %vm471_vm4, %v470_v2   ;;  %869 = vrot.lane.b32.xlu1 %v1121_v1, %s1383_s29  ;;  %vm581_vm4 = vcmask 499104  }
  0xee   :  { %v477_v4 = vpop.permute.xlu0 %476   ;;  %v484_v6 = vpop.permute.xlu1 %483  }
  0xef   :  { %480 = vst.msk [vmem:[#allocation0 + $0x38] sm:$0x1] %vm478_vm5, %v477_v4   ;;  %vm588_vm5 = vcmask 490904  }
  0xf0   :  { %876 = vrot.lane.b32.xlu0 %v1122_v3, %s1384_s5  ;;  %487 = vst.msk [vmem:[#allocation0 + $0x18] sm:$0x1] %vm485_vm6, %v484_v6   ;;  %882 = vrot.lane.b32.xlu1 %v1123_v5, %s1385_s6  ;;  %vm595_vm6 = vcmask 482704  }
  0xf2   :  { %v491_v8 = vpop.permute.xlu0 %490   ;;  %v498_v10 = vpop.permute.xlu1 %497  }
  0xf3   :  { %494 = vst.msk [vmem:[#allocation0 + $0x40] sm:$0x1] %vm492_vm7, %v491_v8   ;;  %vm602_vm7 = vcmask 474504  }
  0xf4   :  { %889 = vrot.lane.b32.xlu0 %v1124_v7, %s1386_s11  ;;  %501 = vst.msk [vmem:[#allocation0 + $0x20] sm:$0x1] %vm499_vm8, %v498_v10   ;;  %896 = vrot.lane.b32.xlu1 %v1125_v9, %s1387_s12  ;;  %vm609_vm8 = vcmask 466304  }
  0xf6   :  { %v505_v12 = vpop.permute.xlu0 %504   ;;  %v511_v14 = vpop.permute.xlu1 %510  }
  0xf7   :  { %507 = vst.msk [vmem:[#allocation0] sm:$0x1] %vm506_vm9, %v505_v12   ;;  %vm616_vm9 = vcmask 458104  }
  0xf8   :  { %903 = vrot.lane.b32.xlu0 %v1126_v11, %s1388_s17  ;;  %514 = vst.msk [vmem:[#allocation0 + $0x28] sm:$0x1] %vm512_vm10, %v511_v14   ;;  %910 = vrot.lane.b32.xlu1 %v1127_v13, %s1389_s18  ;;  %vm623_vm10 = vcmask 449904  }
  0xfa   :  { %v518_v16 = vpop.permute.xlu0 %517   ;;  %v525_v18 = vpop.permute.xlu1 %524  }
  0xfb   :  { %521 = vst.msk [vmem:[#allocation0 + $0x8] sm:$0x1] %vm519_vm11, %v518_v16   ;;  %vm630_vm11 = vcmask 441704  }
  0xfc   :  { %917 = vrot.lane.b32.xlu0 %v1128_v15, %s1390_s23  ;;  %528 = vst.msk [vmem:[#allocation0 + $0x30] sm:$0x1] %vm526_vm12, %v525_v18   ;;  %924 = vrot.lane.b32.xlu1 %v1129_v17, %s1391_s24  ;;  %vm636_vm12 = vcmask 433504  }
  0xfe   :  { %v532_v20 = vpop.permute.xlu0 %531   ;;  %v539_v21 = vpop.permute.xlu1 %538  }
  0xff   :  { %535 = vst.msk [vmem:[#allocation0 + $0x10] sm:$0x1] %vm533_vm13, %v532_v20   ;;  %vm643_vm13 = vcmask 425304  }
 0x100   :  { %931 = vrot.lane.b32.xlu0 %v1130_v19, %s1392_s0  ;;  %542 = vst.msk [vmem:[#allocation0 + $0x38] sm:$0x1] %vm540_vm14, %v539_v21   ;;  %vm650_vm14 = vcmask 417104  }
 0x102   :  { %v546_v22 = vpop.permute.xlu0 %545   ;;  %v553_v23 = vpop.permute.xlu1 %552  }
 0x103   :  { %549 = vst.msk [vmem:[#allocation0 + $0x18] sm:$0x1] %vm547_vm15, %v546_v22   ;;  %vm657_vm15 = vcmask 408904  }
 0x104   :  { %556 = vst.msk [vmem:[#allocation0 + $0x40] sm:$0x1] %vm554_vm1, %v553_v23   ;;  %vm664_vm1 = vcmask 400704  }
 0x106   :  { %v560_v24 = vpop.permute.xlu0 %559   ;;  %v567_v25 = vpop.permute.xlu1 %566  }
 0x107   :  { %563 = vst.msk [vmem:[#allocation0 + $0x20] sm:$0x1] %vm561_vm0, %v560_v24   ;;  %vm671_vm0 = vcmask 392504  }
 0x108   :  { %569 = vst.msk [vmem:[#allocation0] sm:$0x1] %vm568_vm2, %v567_v25   ;;  %vm678_vm2 = vcmask 384304  }
 0x10a   :  { %v573_v26 = vpop.permute.xlu0 %572   ;;  %v580_v27 = vpop.permute.xlu1 %579  }
 0x10b   :  { %576 = vst.msk [vmem:[#allocation0 + $0x28] sm:$0x1] %vm574_vm3, %v573_v26   ;;  %vm685_vm3 = vcmask 376104  }
 0x10c   :  { %583 = vst.msk [vmem:[#allocation0 + $0x8] sm:$0x1] %vm581_vm4, %v580_v27   ;;  %vm692_vm4 = vcmask 367904  }
 0x10e   :  { %v587_v28 = vpop.permute.xlu0 %586   ;;  %v594_v29 = vpop.permute.xlu1 %593  }
 0x10f   :  { %590 = vst.msk [vmem:[#allocation0 + $0x30] sm:$0x1] %vm588_vm5, %v587_v28   ;;  %vm698_vm5 = vcmask 359704  }
 0x110   :  { %597 = vst.msk [vmem:[#allocation0 + $0x10] sm:$0x1] %vm595_vm6, %v594_v29   ;;  %vm705_vm6 = vcmask 351504  }
 0x112   :  { %v601_v30 = vpop.permute.xlu0 %600   ;;  %v608_v31 = vpop.permute.xlu1 %607  }
 0x113   :  { %604 = vst.msk [vmem:[#allocation0 + $0x38] sm:$0x1] %vm602_vm7, %v601_v30   ;;  %vm712_vm7 = vcmask 343304  }
 0x114   :  { %611 = vst.msk [vmem:[#allocation0 + $0x18] sm:$0x1] %vm609_vm8, %v608_v31   ;;  %vm719_vm8 = vcmask 335104  }
 0x116   :  { %v615_v32 = vpop.permute.xlu0 %614   ;;  %v622_v33 = vpop.permute.xlu1 %621  }
 0x117   :  { %618 = vst.msk [vmem:[#allocation0 + $0x40] sm:$0x1] %vm616_vm9, %v615_v32   ;;  %vm726_vm9 = vcmask 326904  }
 0x118   :  { %625 = vst.msk [vmem:[#allocation0 + $0x20] sm:$0x1] %vm623_vm10, %v622_v33   ;;  %vm733_vm10 = vcmask 318704  }
 0x11a   :  { %v629_v34 = vpop.permute.xlu0 %628   ;;  %v635_v35 = vpop.permute.xlu1 %634  }
 0x11b   :  { %631 = vst.msk [vmem:[#allocation0] sm:$0x1] %vm630_vm11, %v629_v34   ;;  %vm740_vm11 = vcmask 310504  }
 0x11c   :  { %638 = vst.msk [vmem:[#allocation0 + $0x28] sm:$0x1] %vm636_vm12, %v635_v35   ;;  %vm747_vm12 = vcmask 302304  }
 0x11e   :  { %v642_v36 = vpop.permute.xlu0 %641   ;;  %v649_v37 = vpop.permute.xlu1 %648  }
 0x11f   :  { %645 = vst.msk [vmem:[#allocation0 + $0x8] sm:$0x1] %vm643_vm13, %v642_v36   ;;  %vm754_vm13 = vcmask 294104  }
 0x120   :  { %652 = vst.msk [vmem:[#allocation0 + $0x30] sm:$0x1] %vm650_vm14, %v649_v37   ;;  %vm760_vm14 = vcmask 285904  }
 0x122   :  { %v656_v38 = vpop.permute.xlu0 %655   ;;  %v663_v39 = vpop.permute.xlu1 %662  }
 0x123   :  { %659 = vst.msk [vmem:[#allocation0 + $0x10] sm:$0x1] %vm657_vm15, %v656_v38   ;;  %vm767_vm15 = vcmask 277704  }
 0x124   :  { %666 = vst.msk [vmem:[#allocation0 + $0x38] sm:$0x1] %vm664_vm1, %v663_v39   ;;  %vm774_vm1 = vcmask 269504  }
 0x126   :  { %v670_v40 = vpop.permute.xlu0 %669   ;;  %v677_v41 = vpop.permute.xlu1 %676  }
 0x127   :  { %673 = vst.msk [vmem:[#allocation0 + $0x18] sm:$0x1] %vm671_vm0, %v670_v40   ;;  %vm781_vm0 = vcmask 261304  }
 0x128   :  { %680 = vst.msk [vmem:[#allocation0 + $0x40] sm:$0x1] %vm678_vm2, %v677_v41   ;;  %vm788_vm2 = vcmask 253104  }
 0x12a   :  { %v684_v42 = vpop.permute.xlu0 %683   ;;  %v691_v43 = vpop.permute.xlu1 %690  }
 0x12b   :  { %687 = vst.msk [vmem:[#allocation0 + $0x20] sm:$0x1] %vm685_vm3, %v684_v42   ;;  %vm795_vm3 = vcmask 244904  }
 0x12c   :  { %693 = vst.msk [vmem:[#allocation0] sm:$0x1] %vm692_vm4, %v691_v43   ;;  %vm802_vm4 = vcmask 236704  }
 0x12e   :  { %v697_v44 = vpop.permute.xlu0 %696   ;;  %v704_v45 = vpop.permute.xlu1 %703  }
 0x12f   :  { %700 = vst.msk [vmem:[#allocation0 + $0x28] sm:$0x1] %vm698_vm5, %v697_v44   ;;  %vm809_vm5 = vcmask 228504  }
 0x130   :  { %707 = vst.msk [vmem:[#allocation0 + $0x8] sm:$0x1] %vm705_vm6, %v704_v45   ;;  %vm816_vm6 = vcmask 220304  }
 0x132   :  { %v711_v46 = vpop.permute.xlu0 %710   ;;  %v718_v47 = vpop.permute.xlu1 %717  }
 0x133   :  { %714 = vst.msk [vmem:[#allocation0 + $0x30] sm:$0x1] %vm712_vm7, %v711_v46   ;;  %vm822_vm7 = vcmask 212104  }
 0x134   :  { %721 = vst.msk [vmem:[#allocation0 + $0x10] sm:$0x1] %vm719_vm8, %v718_v47   ;;  %vm829_vm8 = vcmask 203904  }
 0x136   :  { %v725_v48 = vpop.permute.xlu0 %724   ;;  %v732_v49 = vpop.permute.xlu1 %731  }
 0x137   :  { %728 = vst.msk [vmem:[#allocation0 + $0x38] sm:$0x1] %vm726_vm9, %v725_v48   ;;  %vm836_vm9 = vcmask 195704  }
 0x138   :  { %735 = vst.msk [vmem:[#allocation0 + $0x18] sm:$0x1] %vm733_vm10, %v732_v49   ;;  %vm843_vm10 = vcmask 187504  }
 0x13a   :  { %v739_v50 = vpop.permute.xlu0 %738   ;;  %v746_v51 = vpop.permute.xlu1 %745  }
 0x13b   :  { %742 = vst.msk [vmem:[#allocation0 + $0x40] sm:$0x1] %vm740_vm11, %v739_v50   ;;  %vm850_vm11 = vcmask 179304  }
 0x13c   :  { %749 = vst.msk [vmem:[#allocation0 + $0x20] sm:$0x1] %vm747_vm12, %v746_v51   ;;  %vm857_vm12 = vcmask 171104  }
 0x13e   :  { %v753_v52 = vpop.permute.xlu0 %752   ;;  %v759_v53 = vpop.permute.xlu1 %758  }
 0x13f   :  { %755 = vst.msk [vmem:[#allocation0] sm:$0x1] %vm754_vm13, %v753_v52   ;;  %vm864_vm13 = vcmask 162904  }
 0x140   :  { %762 = vst.msk [vmem:[#allocation0 + $0x28] sm:$0x1] %vm760_vm14, %v759_v53   ;;  %vm871_vm14 = vcmask 154704  }
 0x142   :  { %v766_v54 = vpop.permute.xlu0 %765   ;;  %v773_v55 = vpop.permute.xlu1 %772  }
 0x143   :  { %769 = vst.msk [vmem:[#allocation0 + $0x8] sm:$0x1] %vm767_vm15, %v766_v54   ;;  %vm878_vm15 = vcmask 146504  }
 0x144   :  { %776 = vst.msk [vmem:[#allocation0 + $0x30] sm:$0x1] %vm774_vm1, %v773_v55   ;;  %vm884_vm1 = vcmask 138304  }
 0x146   :  { %v780_v56 = vpop.permute.xlu0 %779   ;;  %v787_v57 = vpop.permute.xlu1 %786  }
 0x147   :  { %783 = vst.msk [vmem:[#allocation0 + $0x10] sm:$0x1] %vm781_vm0, %v780_v56   ;;  %vm891_vm0 = vcmask 130104  }
 0x148   :  { %790 = vst.msk [vmem:[#allocation0 + $0x38] sm:$0x1] %vm788_vm2, %v787_v57   ;;  %vm898_vm2 = vcmask 121904  }
 0x14a   :  { %v794_v58 = vpop.permute.xlu0 %793   ;;  %v801_v59 = vpop.permute.xlu1 %800  }
 0x14b   :  { %797 = vst.msk [vmem:[#allocation0 + $0x18] sm:$0x1] %vm795_vm3, %v794_v58   ;;  %vm905_vm3 = vcmask 113704  }
 0x14c   :  { %804 = vst.msk [vmem:[#allocation0 + $0x40] sm:$0x1] %vm802_vm4, %v801_v59   ;;  %vm912_vm4 = vcmask 105504  }
 0x14e   :  { %v808_v60 = vpop.permute.xlu0 %807   ;;  %v815_v61 = vpop.permute.xlu1 %814  }
 0x14f   :  { %811 = vst.msk [vmem:[#allocation0 + $0x20] sm:$0x1] %vm809_vm5, %v808_v60   ;;  %vm919_vm5 = vcmask 97304  }
 0x150   :  { %817 = vst.msk [vmem:[#allocation0] sm:$0x1] %vm816_vm6, %v815_v61   ;;  %vm926_vm6 = vcmask 89104  }
 0x152   :  { %v821_v62 = vpop.permute.xlu0 %820   ;;  %v828_v63 = vpop.permute.xlu1 %827  }
 0x153   :  { %824 = vst.msk [vmem:[#allocation0 + $0x28] sm:$0x1] %vm822_vm7, %v821_v62   ;;  %vm933_vm7 = vcmask 80904  }
 0x154   :  { %831 = vst.msk [vmem:[#allocation0 + $0x8] sm:$0x1] %vm829_vm8, %v828_v63  }
 0x156   :  { %v835_v0 = vpop.permute.xlu0 %834   ;;  %v842_v1 = vpop.permute.xlu1 %841  }
 0x157   :  { %838 = vst.msk [vmem:[#allocation0 + $0x30] sm:$0x1] %vm836_vm9, %v835_v0  }
 0x158   :  { %845 = vst.msk [vmem:[#allocation0 + $0x10] sm:$0x1] %vm843_vm10, %v842_v1  }
 0x15a   :  { %v849_v2 = vpop.permute.xlu0 %848   ;;  %v856_v3 = vpop.permute.xlu1 %855  }
 0x15b   :  { %852 = vst.msk [vmem:[#allocation0 + $0x38] sm:$0x1] %vm850_vm11, %v849_v2  }
 0x15c   :  { %859 = vst.msk [vmem:[#allocation0 + $0x18] sm:$0x1] %vm857_vm12, %v856_v3  }
 0x15e   :  { %v863_v4 = vpop.permute.xlu0 %862   ;;  %v870_v5 = vpop.permute.xlu1 %869  }
 0x15f   :  { %866 = vst.msk [vmem:[#allocation0 + $0x40] sm:$0x1] %vm864_vm13, %v863_v4  }
 0x160   :  { %873 = vst.msk [vmem:[#allocation0 + $0x20] sm:$0x1] %vm871_vm14, %v870_v5  }
 0x162   :  { %v877_v6 = vpop.permute.xlu0 %876   ;;  %v883_v7 = vpop.permute.xlu1 %882  }
 0x163   :  { %879 = vst.msk [vmem:[#allocation0] sm:$0x1] %vm878_vm15, %v877_v6  }
 0x164   :  { %886 = vst.msk [vmem:[#allocation0 + $0x28] sm:$0x1] %vm884_vm1, %v883_v7  }
 0x166   :  { %v890_v8 = vpop.permute.xlu0 %889   ;;  %v897_v9 = vpop.permute.xlu1 %896  }
 0x167   :  { %893 = vst.msk [vmem:[#allocation0 + $0x8] sm:$0x1] %vm891_vm0, %v890_v8  }
 0x168   :  { %900 = vst.msk [vmem:[#allocation0 + $0x30] sm:$0x1] %vm898_vm2, %v897_v9  }
 0x16a   :  { %v939_v10 = vld [vmem:[#allocation0] sm:$0x1]  ;;  %v904_v11 = vpop.permute.xlu0 %903   ;;  %v911_v13 = vpop.permute.xlu1 %910  }
 0x16b   :  { %941 = vst [vmem:[%s1855_s1] sm:$0x1] %v939_v10  ;;  %v966_v12 = vld [vmem:[#allocation0 + $0x28] sm:$0x1]  ;;  %907 = vst.msk [vmem:[#allocation0 + $0x10] sm:$0x1] %vm905_vm3, %v904_v11  }
 0x16c   :  { %1135 = vst [vmem:[%s1855_s1 + $0x5] sm:$0x1] %v966_v12  ;;  %914 = vst.msk [vmem:[#allocation0 + $0x38] sm:$0x1] %vm912_vm4, %v911_v13  }
 0x16e   :  { %v943_v14 = vld [vmem:[#allocation0 + $0x8] sm:$0x1]  ;;  %v918_v15 = vpop.permute.xlu0 %917   ;;  %v925_v17 = vpop.permute.xlu1 %924  }
 0x16f   :  { %1131 = vst [vmem:[%s1855_s1 + $0x1] sm:$0x1] %v943_v14  ;;  %v972_v16 = vld [vmem:[#allocation0 + $0x30] sm:$0x1]  ;;  %921 = vst.msk [vmem:[#allocation0 + $0x18] sm:$0x1] %vm919_vm5, %v918_v15  }
 0x170   :  { %1136 = vst [vmem:[%s1855_s1 + $0x6] sm:$0x1] %v972_v16  ;;  %928 = vst.msk [vmem:[#allocation0 + $0x40] sm:$0x1] %vm926_vm6, %v925_v17  }
 0x172   :  { %v948_v18 = vld [vmem:[#allocation0 + $0x10] sm:$0x1]  ;;  %v932_v19 = vpop.permute.xlu0 %931  }
 0x173   :  { %1132 = vst [vmem:[%s1855_s1 + $0x2] sm:$0x1] %v948_v18  ;;  %v978_v20 = vld [vmem:[#allocation0 + $0x38] sm:$0x1]  ;;  %935 = vst.msk [vmem:[#allocation0 + $0x20] sm:$0x1] %vm933_vm7, %v932_v19  }
 0x174   :  { %1137 = vst [vmem:[%s1855_s1 + $0x7] sm:$0x1] %v978_v20 }
 0x176   :  { %v954_v21 = vld [vmem:[#allocation0 + $0x18] sm:$0x1] }
 0x177   :  { %1133 = vst [vmem:[%s1855_s1 + $0x3] sm:$0x1] %v954_v21  ;;  %v984_v22 = vld [vmem:[#allocation0 + $0x40] sm:$0x1] }
 0x178   :  { %1138 = vst [vmem:[%s1855_s1 + $0x8] sm:$0x1] %v984_v22 }
 0x17a   :  { %v960_v23 = vld [vmem:[#allocation0 + $0x20] sm:$0x1] }
 0x17b   :  { %1134 = vst [vmem:[%s1855_s1 + $0x4] sm:$0x1] %v960_v23 }

// kernel: model_param_forward.1
= control target key start
LH: loop header
LB: loop body
LE: loop exit
PB: predicated region body
PF: predicated region fallthrough
CT: control target
= control target key end

     0   :  { %v18_v0 = vlaneseq  ;;  %s60_s0 = inlined_call_operand.vmem [shape: f32[1,1152], index: 0, kind: input, shape index: {}]   ;;  %s61_s1 = inlined_call_operand.vmem [shape: f32[1,1152], index: 1, kind: input, shape index: {}]   ;;  %s62_s2 = inlined_call_operand.vmem [shape: f32[1,1152], index: 2, kind: output, shape index: {}]  }
   0x1   :  { %v11_v1 = vld [vmem:[%s60_s0] sm:$0xff]  ;;  %v12_v2 = vld [vmem:[%s60_s0 + $0x8] sm:$0x1] }
   0x2   :  { %v13_v3 = vld [vmem:[%s61_s1] sm:$0xff]  ;;  %v14_v4 = vld [vmem:[%s61_s1 + $0x8] sm:$0x1]  ;;  %vm20_vm0 = vcmp.lt.s32.totalorder %v18_v0, 128 }
   0x3   :  { %v15_v5 = vmul.f32 %v13_v3, %v11_v1  ;;  %v16_v6 = vmul.f32 %v14_v4, %v12_v2 }
   0x5   :  { %17 = vst [vmem:[%s62_s2] sm:$0xff] %v15_v5  ;;  %22 = vst.msk [vmem:[%s62_s2 + $0x8] sm:$0x1] %vm20_vm0, %v16_v6 }

</bundles_post_ra>
